<compile_context>
chip_gen: v7x
topology: tpu7x:2x2x1
jax: 0.10.0
libtpu: 0.0.40
codegen_flags: <defaults>
</compile_context>

<pallas_src>
import functools

import jax
import jax.numpy as jnp
from jax.experimental import pallas as pl
from jax.experimental.pallas import tpu as pltpu

ALPHA = 0.8


def _round_up(x, m):
    return ((x + m - 1) // m) * m


def _appnp_kernel(h0T_ref, adjT_ref, w_out_ref, b_out_ref, o_ref, h_ref, *,
                  one_minus_alpha):
    """Grid = (n_layers, n_tiles); feature-major layout.

    h0T:  (H, Np) f32, resident.
    adjT: alpha-folded transposed adjacency — either the full resident (Np, Np)
          matrix or a streamed (Np, tile_n) column panel.
    h:    (H, 2*Np) ping-pong scratch in propagate dtype (slot = (l % 2) * Np).
    o:    (C, tile_n) panel of out^T, written only on the last layer.
    """
    l = pl.program_id(0)                 # layer index
    j = pl.program_id(1)                 # node-panel index
    tile_n = o_ref.shape[-1]
    n_pad = h_ref.shape[-1] // 2
    prop_dtype = h_ref.dtype

    # First grid step: seed ping-pong slot 0 with h0.
    @pl.when(jnp.logical_and(l == 0, j == 0))
    def _():
        h_ref[:, :n_pad] = h0T_ref[...].astype(prop_dtype)

    cur = l % 2
    src = pl.multiple_of(cur * n_pad, n_pad)                       # read slot
    start = pl.multiple_of(j * tile_n, tile_n)                     # panel offset
    dst = pl.multiple_of((1 - cur) * n_pad + j * tile_n, tile_n)   # write slot

    h_cur = h_ref[:, pl.ds(src, n_pad)]                            # (H, Np)

    if adjT_ref.shape[-1] == tile_n:       # streamed panel (or resident == panel)
        adjT_panel = adjT_ref[...]
    else:                                  # resident: slice the column panel
        adjT_panel = adjT_ref[:, pl.ds(start, tile_n)]

    # (alpha * adj @ h)^T for this panel; f32 accumulation on the MXU.
    prop = jnp.dot(h_cur, adjT_panel, preferred_element_type=jnp.float32)
    new_tile = prop + one_minus_alpha * h0T_ref[:, pl.ds(start, tile_n)]

    # Next layer's input goes to the opposite ping-pong slot (no commit copy).
    h_ref[:, pl.ds(dst, tile_n)] = new_tile.astype(prop_dtype)

    # Fused linear_out, last layer only. Earlier write-backs of this output
    # block are dead and get overwritten by the final layer's stores.
    @pl.when(l == pl.num_programs(0) - 1)
    def _():
        o_ref[...] = (jnp.dot(w_out_ref[...], new_tile,
                              preferred_element_type=jnp.float32)
                      + b_out_ref[...]).astype(o_ref.dtype)


def appnp_forward(x, adj, w_in, b_in, w_out, b_out, *, n_layers, alpha=ALPHA,
                  propagate_dtype=jnp.bfloat16, max_tile_n=512):
    """x: (N, F), adj: (N, N) dense row-normalized, w_in: (H, F), b_in: (H,),
    w_out: (C, H), b_out: (C,).  Returns (N, C) logits."""
    n = x.shape[0]
    n_hid = w_in.shape[0]
    n_classes = w_out.shape[0]

    # linear_in hoisted out of the kernel (tiny op; keeps the full x^T out of
    # VMEM and removes the serial cold-start matmul — see perf review).
    h0 = x @ w_in.T + b_in                                  # (N, H) f32
    if n_layers == 0:                                       # degenerate case
        return h0 @ w_out.T + b_out

    # Node-panel tiling; pad N so panels divide evenly.
    tile_n = min(max_tile_n, _round_up(n, 128))
    n_pad = _round_up(n, tile_n)
    n_tiles = n_pad // tile_n

    # Feature-major operands; fold alpha into the transposed adjacency.
    # NOTE: for a fixed graph adjT should be computed once and cached outside
    # the hot path (it is an Np^2 read+write in XLA per call).
    h0T = jnp.pad(h0.T, ((0, 0), (0, n_pad - n)))                        # (H, Np)
    adjT = jnp.pad(alpha * adj, ((0, n_pad - n), (0, n_pad - n))).T
    adjT = adjT.astype(propagate_dtype)                                  # (Np, Np)
    b_out_2d = b_out.reshape(n_classes, 1).astype(jnp.float32)

    prop_item = jnp.dtype(propagate_dtype).itemsize
    try:
        vmem_cap = int(pltpu.get_tpu_info().vmem_capacity_bytes)
    except Exception:
        vmem_cap = 64 * 1024 * 1024      # conservative (v7x-sized) fallback

    def _run(single_buffer):
        spec_kwargs = {"pipeline_mode": pl.Buffered(1)} if single_buffer else {}
        nbuf = 1 if single_buffer else 2

        def const_spec(shape):
            return pl.BlockSpec(shape, lambda l, j: (0,) * len(shape),
                                **spec_kwargs)

        # --- VMEM budgeting (bytes) ---
        resident_in = nbuf * (n_hid * n_pad * 4                 # h0T
                              + n_classes * n_hid * 4           # W_out
                              + n_classes * 128 * 4)            # b_out (padded)
        scratch = n_hid * 2 * n_pad * prop_item                 # h ping-pong
        out_buf = 2 * n_classes * tile_n * 4                    # out panels
        values = (n_hid * n_pad * prop_item                     # h_cur value
                  + n_pad * tile_n * prop_item                  # adjT panel value
                  + 4 * n_hid * tile_n * 4) + (2 << 20)         # f32 temporaries
        adj_resident_bytes = nbuf * n_pad * n_pad * prop_item
        adj_streamed_bytes = 2 * n_pad * tile_n * prop_item

        budget = int(0.8 * vmem_cap)
        adj_resident = (adj_resident_bytes + resident_in + scratch + out_buf
                        + values) <= budget

        if adj_resident:
            # Fetched once (constant block index); re-used for all layers.
            adj_spec = const_spec((n_pad, n_pad))
            adj_bytes = adj_resident_bytes
        else:
            # Streamed column panels, double-buffered for DMA/compute overlap.
            adj_spec = pl.BlockSpec((n_pad, tile_n), lambda l, j: (0, j))
            adj_bytes = adj_streamed_bytes

        est = adj_bytes + resident_in + scratch + out_buf + values
        vmem_limit = int(min(0.9 * vmem_cap, max(2 * est, 32 * 1024 * 1024)))

        kernel = functools.partial(_appnp_kernel, one_minus_alpha=1.0 - alpha)

        return pl.pallas_call(
            kernel,
            out_shape=jax.ShapeDtypeStruct((n_classes, n_pad), x.dtype),
            grid_spec=pltpu.PrefetchScalarGridSpec(
                num_scalar_prefetch=0,
                grid=(n_layers, n_tiles),
                in_specs=[
                    const_spec((n_hid, n_pad)),        # h0^T (resident)
                    adj_spec,                          # alpha * adj^T
                    const_spec((n_classes, n_hid)),    # W_out
                    const_spec((n_classes, 1)),        # b_out
                ],
                out_specs=pl.BlockSpec((n_classes, tile_n), lambda l, j: (0, j)),
                scratch_shapes=[
                    pltpu.VMEM((n_hid, 2 * n_pad), propagate_dtype),  # h ping-pong
                ],
            ),
            compiler_params=pltpu.CompilerParams(
                # Layer axis is a true dependency; panel axis shares h scratch.
                # TODO(synk): v7x dual-TC split of the panel axis via pl.core_map.
                dimension_semantics=("arbitrary", "arbitrary"),
                vmem_limit_bytes=vmem_limit,
            ),
        )(h0T, adjT, w_out.astype(jnp.float32), b_out_2d)

    try:
        outT = _run(single_buffer=True)
    except Exception:
        # pl.Buffered(1) not accepted by this JAX build: fall back to the
        # default double-buffered pipeline (identical semantics).
        outT = _run(single_buffer=False)

    return outT[:, :n].T                                   # (N, C)


def _torch_linear_init(key, out_features, in_features):
    """torch.nn.Linear-style uniform(-1/sqrt(fan_in), 1/sqrt(fan_in)) init."""
    kw, kb = jax.random.split(key)
    bound = 1.0 / (in_features ** 0.5)
    w = jax.random.uniform(kw, (out_features, in_features), jnp.float32,
                           -bound, bound)
    b = jax.random.uniform(kb, (out_features,), jnp.float32, -bound, bound)
    return w, b


def _reference(x, adj, w_in, b_in, w_out, b_out, n_layers):
    h = x @ w_in.T + b_in
    h0 = h
    for _ in range(n_layers):
        h = ALPHA * (adj @ h) + (1.0 - ALPHA) * h0
    return h @ w_out.T + b_out


if __name__ == "__main__":
    # Small, module-consistent shapes.
    N, n_feat, n_hid, n_classes, n_layers = 256, 64, 32, 16, 3

    key = jax.random.PRNGKey(0)
    k_x, k_adj, k_lin_in, k_lin_out = jax.random.split(key, 4)

    # Node features.
    x = jax.random.normal(k_x, (N, n_feat), jnp.float32)

    # Dense row-normalized adjacency (with self loops).
    a = (jax.random.uniform(k_adj, (N, N)) < 0.1).astype(jnp.float32)
    a = a + jnp.eye(N, dtype=jnp.float32)
    adj = a / jnp.sum(a, axis=1, keepdims=True)

    # Deterministic params (linear_in: n_feat->n_hid, linear_out: n_hid->n_classes).
    w_in, b_in = _torch_linear_init(k_lin_in, n_hid, n_feat)
    w_out, b_out = _torch_linear_init(k_lin_out, n_classes, n_hid)

    ref = _reference(x, adj, w_in, b_in, w_out, b_out, n_layers)

    # Performance default: bf16 adjacency / hidden-state propagation.
    out_bf16 = appnp_forward(x, adj, w_in, b_in, w_out, b_out,
                             n_layers=n_layers)
    out_bf16 = jax.block_until_ready(out_bf16)
    assert out_bf16.shape == (N, n_classes)
    assert jnp.allclose(out_bf16, ref, atol=5e-2, rtol=5e-2), \
        "bf16-propagation mismatch vs reference"

    # Full-precision path matches the PyTorch-equivalent reference tightly.
    out_f32 = appnp_forward(x, adj, w_in, b_in, w_out, b_out,
                            n_layers=n_layers, propagate_dtype=jnp.float32)
    out_f32 = jax.block_until_ready(out_f32)
    assert out_f32.shape == (N, n_classes)
    assert jnp.allclose(out_f32, ref, atol=1e-4, rtol=1e-4), \
        "f32-propagation mismatch vs reference"

    print("KERNEL_OK")
</pallas_src>

<mosaic_0001>
module attributes {stable_mosaic.version = 11 : i64} {
  func.func @_appnp_kernel(%arg0: i32, %arg1: i32, %arg2: memref<32x256xf32, #tpu.memory_space<vmem>>, %arg3: memref<256x256xbf16, #tpu.memory_space<vmem>>, %arg4: memref<16x32xf32, #tpu.memory_space<vmem>>, %arg5: memref<16x1xf32, #tpu.memory_space<vmem>>, %arg6: memref<16x256xf32, #tpu.memory_space<vmem>>, %arg7: memref<32x512xbf16, #tpu.memory_space<vmem>>) attributes {dimension_semantics = [#tpu.dimension_semantics<arbitrary>, #tpu.dimension_semantics<arbitrary>], iteration_bounds = array<i64: 3, 1>, scalar_prefetch = 0 : i64, scratch_operands = 1 : i64, tpu.core_type = #tpu.core_type<tc>, window_params = [{pipeline_mode = #tpu.pipeline_mode<synchronous>, transform_indices = @transform_0, window_bounds = array<i64: 32, 256>}, {pipeline_mode = #tpu.pipeline_mode<synchronous>, transform_indices = @transform_1, window_bounds = array<i64: 256, 256>}, {pipeline_mode = #tpu.pipeline_mode<synchronous>, transform_indices = @transform_2, window_bounds = array<i64: 16, 32>}, {pipeline_mode = #tpu.pipeline_mode<synchronous>, transform_indices = @transform_3, window_bounds = array<i64: 16, 1>}, {transform_indices = @transform_4, window_bounds = array<i64: 16, 256>}]} {
    %c0_i32 = arith.constant 0 : i32
    %0 = arith.cmpi eq, %arg0, %c0_i32 : i32
    %c0_i32_0 = arith.constant 0 : i32
    %1 = arith.cmpi eq, %arg1, %c0_i32_0 : i32
    %2 = arith.andi %0, %1 : i1
    %3 = arith.extui %2 : i1 to i32
    %c0_i32_1 = arith.constant 0 : i32
    %4 = arith.cmpi ne, %3, %c0_i32_1 : i32
    scf.if %4 {
      %c0_17 = arith.constant 0 : index
      %c0_18 = arith.constant 0 : index
      %39 = vector.load %arg2[%c0_17, %c0_18] : memref<32x256xf32, #tpu.memory_space<vmem>>, vector<32x256xf32>
      %40 = arith.truncf %39 : vector<32x256xf32> to vector<32x256xbf16>
      %c0_19 = arith.constant 0 : index
      %c0_20 = arith.constant 0 : index
      %41 = vector.load %arg7[%c0_19, %c0_20] : memref<32x512xbf16, #tpu.memory_space<vmem>>, vector<32x256xbf16>
      tpu.vector_store %arg7[%c0_19, %c0_20], %40 {strides = array<i32>} : memref<32x512xbf16, #tpu.memory_space<vmem>>, vector<32x256xbf16>,
    } else {
    }
    %c2_i32 = arith.constant 2 : i32
    %c0_i32_2 = arith.constant 0 : i32
    %5 = arith.cmpi eq, %c2_i32, %c0_i32_2 : i32
    %c1_i32 = arith.constant 1 : i32
    %6 = arith.select %5, %c1_i32, %c2_i32 : i32
    %7 = arith.remsi %arg0, %6 : i32
    %c0_i32_3 = arith.constant 0 : i32
    %8 = arith.cmpi ne, %7, %c0_i32_3 : i32
    %c0_i32_4 = arith.constant 0 : i32
    %9 = arith.cmpi slt, %7, %c0_i32_4 : i32
    %c0_i32_5 = arith.constant 0 : i32
    %10 = arith.cmpi slt, %6, %c0_i32_5 : i32
    %11 = arith.xori %9, %10 : i1
    %12 = arith.andi %11, %8 : i1
    %13 = arith.addi %7, %6 : i32
    %14 = arith.select %12, %13, %7 : i32
    %c256_i32 = arith.constant 256 : i32
    %15 = arith.muli %14, %c256_i32 : i32
    %16 = tpu.assume_multiple %15, 256 : i32
    %c256_i32_6 = arith.constant 256 : i32
    %17 = arith.muli %arg1, %c256_i32_6 : i32
    %18 = tpu.assume_multiple %17, 256 : i32
    %c1_i32_7 = arith.constant 1 : i32
    %19 = arith.subi %c1_i32_7, %14 : i32
    %c256_i32_8 = arith.constant 256 : i32
    %20 = arith.muli %19, %c256_i32_8 : i32
    %c256_i32_9 = arith.constant 256 : i32
    %21 = arith.muli %arg1, %c256_i32_9 : i32
    %22 = arith.addi %20, %21 : i32
    %23 = tpu.assume_multiple %22, 256 : i32
    %c0 = arith.constant 0 : index
    %24 = arith.index_cast %16 : i32 to index
    %25 = vector.load %arg7[%c0, %24] : memref<32x512xbf16, #tpu.memory_space<vmem>>, vector<32x256xbf16>
    %c0_10 = arith.constant 0 : index
    %c0_11 = arith.constant 0 : index
    %26 = vector.load %arg3[%c0_10, %c0_11] : memref<256x256xbf16, #tpu.memory_space<vmem>>, vector<256x256xbf16>
    %cst = arith.constant dense<0.000000e+00> : vector<32x256xf32>
    %27 = tpu.matmul %25, %26, %cst {dimension_numbers = #tpu.dot_dimension_numbers<[1], [0], [0], [1], [0, 0, 1, 1], [], []>} : vector<32x256xbf16>, vector<256x256xbf16>, vector<32x256xf32> -> vector<32x256xf32>
    %c0_12 = arith.constant 0 : index
    %28 = arith.index_cast %18 : i32 to index
    %29 = vector.load %arg2[%c0_12, %28] : memref<32x256xf32, #tpu.memory_space<vmem>>, vector<32x256xf32>
    %cst_13 = arith.constant 2.000000e-01 : f32
    %30 = vector.broadcast %cst_13 : f32 to vector<32x256xf32>
    %31 = arith.mulf %30, %29 : vector<32x256xf32>
    %32 = arith.addf %27, %31 : vector<32x256xf32>
    %33 = arith.truncf %32 : vector<32x256xf32> to vector<32x256xbf16>
    %c0_14 = arith.constant 0 : index
    %34 = arith.index_cast %23 : i32 to index
    %35 = vector.load %arg7[%c0_14, %34] : memref<32x512xbf16, #tpu.memory_space<vmem>>, vector<32x256xbf16>
    tpu.vector_store %arg7[%c0_14, %34], %33 {strides = array<i32>} : memref<32x512xbf16, #tpu.memory_space<vmem>>, vector<32x256xbf16>,
    %c2_i32_15 = arith.constant 2 : i32
    %36 = arith.cmpi eq, %arg0, %c2_i32_15 : i32
    %37 = arith.extui %36 : i1 to i32
    %c0_i32_16 = arith.constant 0 : i32
    %38 = arith.cmpi ne, %37, %c0_i32_16 : i32
    scf.if %38 {
      %c0_17 = arith.constant 0 : index
      %c0_18 = arith.constant 0 : index
      %39 = vector.load %arg4[%c0_17, %c0_18] : memref<16x32xf32, #tpu.memory_space<vmem>>, vector<16x32xf32>
      %cst_19 = arith.constant dense<0.000000e+00> : vector<16x256xf32>
      %40 = tpu.matmul %39, %32, %cst_19 {dimension_numbers = #tpu.dot_dimension_numbers<[1], [0], [0], [1], [0, 0, 1, 1], [], []>} : vector<16x32xf32>, vector<32x256xf32>, vector<16x256xf32> -> vector<16x256xf32>
      %c0_20 = arith.constant 0 : index
      %c0_21 = arith.constant 0 : index
      %41 = vector.load %arg5[%c0_20, %c0_21] : memref<16x1xf32, #tpu.memory_space<vmem>>, vector<16x1xf32>
      %42 = vector.broadcast %41 : vector<16x1xf32> to vector<16x256xf32>
      %43 = arith.addf %40, %42 : vector<16x256xf32>
      %c0_22 = arith.constant 0 : index
      %c0_23 = arith.constant 0 : index
      %44 = vector.load %arg6[%c0_22, %c0_23] : memref<16x256xf32, #tpu.memory_space<vmem>>, vector<16x256xf32>
      tpu.vector_store %arg6[%c0_22, %c0_23], %43 {strides = array<i32>} : memref<16x256xf32, #tpu.memory_space<vmem>>, vector<16x256xf32>,
    } else {
    }
    return
  }
  func.func @transform_0(%arg0: i32, %arg1: i32) -> (i32, i32) {
    %c0_i32 = arith.constant 0 : i32
    %c0_i32_0 = arith.constant 0 : i32
    %c0_i32_1 = arith.constant 0 : i32
    return %c0_i32, %c0_i32_0 : i32, i32
  }
  func.func @transform_1(%arg0: i32, %arg1: i32) -> (i32, i32) {
    %c0_i32 = arith.constant 0 : i32
    %c0_i32_0 = arith.constant 0 : i32
    %c0_i32_1 = arith.constant 0 : i32
    return %c0_i32, %c0_i32_0 : i32, i32
  }
  func.func @transform_2(%arg0: i32, %arg1: i32) -> (i32, i32) {
    %c0_i32 = arith.constant 0 : i32
    %c0_i32_0 = arith.constant 0 : i32
    %c0_i32_1 = arith.constant 0 : i32
    return %c0_i32, %c0_i32_0 : i32, i32
  }
  func.func @transform_3(%arg0: i32, %arg1: i32) -> (i32, i32) {
    %c0_i32 = arith.constant 0 : i32
    %c0_i32_0 = arith.constant 0 : i32
    %c0_i32_1 = arith.constant 0 : i32
    return %c0_i32, %c0_i32_0 : i32, i32
  }
  func.func @transform_4(%arg0: i32, %arg1: i32) -> (i32, i32) {
    %c0_i32 = arith.constant 0 : i32
    %c0_i32_0 = arith.constant 0 : i32
    return %c0_i32, %arg1 : i32, i32
  }
}

module attributes {stable_mosaic.version = 11 : i64} {
  func.func @_appnp_kernel(%arg0: i32, %arg1: i32, %arg2: memref<32x256xf32, #tpu.memory_space<vmem>>, %arg3: memref<256x256xbf16, #tpu.memory_space<vmem>>, %arg4: memref<16x32xf32, #tpu.memory_space<vmem>>, %arg5: memref<16x1xf32, #tpu.memory_space<vmem>>, %arg6: memref<16x256xf32, #tpu.memory_space<vmem>>, %arg7: memref<32x512xbf16, #tpu.memory_space<vmem>>) attributes {dimension_semantics = [#tpu.dimension_semantics<arbitrary>, #tpu.dimension_semantics<arbitrary>], iteration_bounds = array<i64: 3, 1>, scalar_prefetch = 0 : i64, scratch_operands = 1 : i64, tpu.core_type = #tpu.core_type<tc>, window_params = [{pipeline_mode = #tpu.pipeline_mode<synchronous>, transform_indices = @transform_0, window_bounds = array<i64: 32, 256>}, {pipeline_mode = #tpu.pipeline_mode<synchronous>, transform_indices = @transform_1, window_bounds = array<i64: 256, 256>}, {pipeline_mode = #tpu.pipeline_mode<synchronous>, transform_indices = @transform_2, window_bounds = array<i64: 16, 32>}, {pipeline_mode = #tpu.pipeline_mode<synchronous>, transform_indices = @transform_3, window_bounds = array<i64: 16, 1>}, {transform_indices = @transform_4, window_bounds = array<i64: 16, 256>}]} {
    %c0_i32 = arith.constant 0 : i32
    %0 = arith.cmpi eq, %arg0, %c0_i32 : i32
    %c0_i32_0 = arith.constant 0 : i32
    %1 = arith.cmpi eq, %arg1, %c0_i32_0 : i32
    %2 = arith.andi %0, %1 : i1
    %3 = arith.extui %2 : i1 to i32
    %c0_i32_1 = arith.constant 0 : i32
    %4 = arith.cmpi ne, %3, %c0_i32_1 : i32
    scf.if %4 {
      %c0_17 = arith.constant 0 : index
      %c0_18 = arith.constant 0 : index
      %39 = vector.load %arg2[%c0_17, %c0_18] : memref<32x256xf32, #tpu.memory_space<vmem>>, vector<32x256xf32>
      %40 = arith.truncf %39 : vector<32x256xf32> to vector<32x256xbf16>
      %c0_19 = arith.constant 0 : index
      %c0_20 = arith.constant 0 : index
      %41 = vector.load %arg7[%c0_19, %c0_20] : memref<32x512xbf16, #tpu.memory_space<vmem>>, vector<32x256xbf16>
      tpu.vector_store %arg7[%c0_19, %c0_20], %40 {strides = array<i32>} : memref<32x512xbf16, #tpu.memory_space<vmem>>, vector<32x256xbf16>,
    } else {
    }
    %c2_i32 = arith.constant 2 : i32
    %c0_i32_2 = arith.constant 0 : i32
    %5 = arith.cmpi eq, %c2_i32, %c0_i32_2 : i32
    %c1_i32 = arith.constant 1 : i32
    %6 = arith.select %5, %c1_i32, %c2_i32 : i32
    %7 = arith.remsi %arg0, %6 : i32
    %c0_i32_3 = arith.constant 0 : i32
    %8 = arith.cmpi ne, %7, %c0_i32_3 : i32
    %c0_i32_4 = arith.constant 0 : i32
    %9 = arith.cmpi slt, %7, %c0_i32_4 : i32
    %c0_i32_5 = arith.constant 0 : i32
    %10 = arith.cmpi slt, %6, %c0_i32_5 : i32
    %11 = arith.xori %9, %10 : i1
    %12 = arith.andi %11, %8 : i1
    %13 = arith.addi %7, %6 : i32
    %14 = arith.select %12, %13, %7 : i32
    %c256_i32 = arith.constant 256 : i32
    %15 = arith.muli %14, %c256_i32 : i32
    %16 = tpu.assume_multiple %15, 256 : i32
    %c256_i32_6 = arith.constant 256 : i32
    %17 = arith.muli %arg1, %c256_i32_6 : i32
    %18 = tpu.assume_multiple %17, 256 : i32
    %c1_i32_7 = arith.constant 1 : i32
    %19 = arith.subi %c1_i32_7, %14 : i32
    %c256_i32_8 = arith.constant 256 : i32
    %20 = arith.muli %19, %c256_i32_8 : i32
    %c256_i32_9 = arith.constant 256 : i32
    %21 = arith.muli %arg1, %c256_i32_9 : i32
    %22 = arith.addi %20, %21 : i32
    %23 = tpu.assume_multiple %22, 256 : i32
    %c0 = arith.constant 0 : index
    %24 = arith.index_cast %16 : i32 to index
    %25 = vector.load %arg7[%c0, %24] : memref<32x512xbf16, #tpu.memory_space<vmem>>, vector<32x256xbf16>
    %c0_10 = arith.constant 0 : index
    %c0_11 = arith.constant 0 : index
    %26 = vector.load %arg3[%c0_10, %c0_11] : memref<256x256xbf16, #tpu.memory_space<vmem>>, vector<256x256xbf16>
    %cst = arith.constant dense<0.000000e+00> : vector<32x256xf32>
    %27 = tpu.matmul %25, %26, %cst {dimension_numbers = #tpu.dot_dimension_numbers<[1], [0], [0], [1], [0, 0, 1, 1], [], []>} : vector<32x256xbf16>, vector<256x256xbf16>, vector<32x256xf32> -> vector<32x256xf32>
    %c0_12 = arith.constant 0 : index
    %28 = arith.index_cast %18 : i32 to index
    %29 = vector.load %arg2[%c0_12, %28] : memref<32x256xf32, #tpu.memory_space<vmem>>, vector<32x256xf32>
    %cst_13 = arith.constant 2.000000e-01 : f32
    %30 = vector.broadcast %cst_13 : f32 to vector<32x256xf32>
    %31 = arith.mulf %30, %29 : vector<32x256xf32>
    %32 = arith.addf %27, %31 : vector<32x256xf32>
    %33 = arith.truncf %32 : vector<32x256xf32> to vector<32x256xbf16>
    %c0_14 = arith.constant 0 : index
    %34 = arith.index_cast %23 : i32 to index
    %35 = vector.load %arg7[%c0_14, %34] : memref<32x512xbf16, #tpu.memory_space<vmem>>, vector<32x256xbf16>
    tpu.vector_store %arg7[%c0_14, %34], %33 {strides = array<i32>} : memref<32x512xbf16, #tpu.memory_space<vmem>>, vector<32x256xbf16>,
    %c2_i32_15 = arith.constant 2 : i32
    %36 = arith.cmpi eq, %arg0, %c2_i32_15 : i32
    %37 = arith.extui %36 : i1 to i32
    %c0_i32_16 = arith.constant 0 : i32
    %38 = arith.cmpi ne, %37, %c0_i32_16 : i32
    scf.if %38 {
      %c0_17 = arith.constant 0 : index
      %c0_18 = arith.constant 0 : index
      %39 = vector.load %arg4[%c0_17, %c0_18] : memref<16x32xf32, #tpu.memory_space<vmem>>, vector<16x32xf32>
      %cst_19 = arith.constant dense<0.000000e+00> : vector<16x256xf32>
      %40 = tpu.matmul %39, %32, %cst_19 {dimension_numbers = #tpu.dot_dimension_numbers<[1], [0], [0], [1], [0, 0, 1, 1], [], []>} : vector<16x32xf32>, vector<32x256xf32>, vector<16x256xf32> -> vector<16x256xf32>
      %c0_20 = arith.constant 0 : index
      %c0_21 = arith.constant 0 : index
      %41 = vector.load %arg5[%c0_20, %c0_21] : memref<16x1xf32, #tpu.memory_space<vmem>>, vector<16x1xf32>
      %42 = vector.broadcast %41 : vector<16x1xf32> to vector<16x256xf32>
      %43 = arith.addf %40, %42 : vector<16x256xf32>
      %c0_22 = arith.constant 0 : index
      %c0_23 = arith.constant 0 : index
      %44 = vector.load %arg6[%c0_22, %c0_23] : memref<16x256xf32, #tpu.memory_space<vmem>>, vector<16x256xf32>
      tpu.vector_store %arg6[%c0_22, %c0_23], %43 {strides = array<i32>} : memref<16x256xf32, #tpu.memory_space<vmem>>, vector<16x256xf32>,
    } else {
    }
    return
  }
  func.func @transform_0(%arg0: i32, %arg1: i32) -> (i32, i32) {
    %c0_i32 = arith.constant 0 : i32
    %c0_i32_0 = arith.constant 0 : i32
    %c0_i32_1 = arith.constant 0 : i32
    return %c0_i32, %c0_i32_0 : i32, i32
  }
  func.func @transform_1(%arg0: i32, %arg1: i32) -> (i32, i32) {
    %c0_i32 = arith.constant 0 : i32
    %c0_i32_0 = arith.constant 0 : i32
    %c0_i32_1 = arith.constant 0 : i32
    return %c0_i32, %c0_i32_0 : i32, i32
  }
  func.func @transform_2(%arg0: i32, %arg1: i32) -> (i32, i32) {
    %c0_i32 = arith.constant 0 : i32
    %c0_i32_0 = arith.constant 0 : i32
    %c0_i32_1 = arith.constant 0 : i32
    return %c0_i32, %c0_i32_0 : i32, i32
  }
  func.func @transform_3(%arg0: i32, %arg1: i32) -> (i32, i32) {
    %c0_i32 = arith.constant 0 : i32
    %c0_i32_0 = arith.constant 0 : i32
    %c0_i32_1 = arith.constant 0 : i32
    return %c0_i32, %c0_i32_0 : i32, i32
  }
  func.func @transform_4(%arg0: i32, %arg1: i32) -> (i32, i32) {
    %c0_i32 = arith.constant 0 : i32
    %c0_i32_0 = arith.constant 0 : i32
    return %c0_i32, %arg1 : i32, i32
  }
}

</mosaic_0001>

<bundles_post_ra>
// kernel: tpu_custom_call.1
= control target key start
LH: loop header
LB: loop body
LE: loop exit
PB: predicated region body
PF: predicated region fallthrough
CT: control target
= control target key end

     0   :  { %9 = vsyncpa [#allocation4], 0  ;;  %s1246_s0 = inlined_call_operand.hbm [shape: f32[32,256], index: 0, kind: input, shape index: {}]   ;;  %s1247_s1 = inlined_call_operand.hbm [shape: bf16[256,256], index: 1, kind: input, shape index: {}]   ;;  %s1248_s2 = inlined_call_operand.vmem [shape: f32[16,32], index: 2, kind: input, shape index: {}]   ;;  %s1249_s3 = inlined_call_operand.vmem [shape: f32[16,1], index: 3, kind: input, shape index: {}]   ;;  %s1250_s4 = inlined_call_operand.hbm [shape: f32[16,256], index: 4, kind: output, shape index: {}]  }
   0x1   :  { %10 = vsyncpa [#allocation7], 0 }
   0x2   :  { %11 = vsyncpa [#allocation5], 0  ;;  %s1082_s15 = smov 0   ;;  %s1084_s16 = smov 0  }
   0x3   :  { %s1086_s17 = smov 0  }
   0x4 LB: > { %s720_s18 = sadd.s32 4294967295, %s1044_s17   ;;  %s29_s19 = sadd.s32 1, %s1040_s16  ;;  %s1044_s17 = sphi %s1086_s17, %s17_s17   ;;  %s1040_s16 = sphi %s1084_s16, %s1261_s16   ;;  %s1036_s15 = sphi %s1082_s15, %s1260_s15  }
   0x5   : > { %p31_p0 = scmp.ge.s32.totalorder %s29_s19, 3  ;;  %p721_p1 = scmp.ge.s32.totalorder %s1044_s17, 1 }
   0x6   : > { %p144_p2 = scmp.lt.s32.totalorder %s1044_s17, 4  ;;  %p1109_p4 = scmp.eq.s32.totalorder %s720_s18, 0 }
   0x7   : > { %s1263_s19 = smov (%p31_p0, %s29_s19), 0  ;;  %s1046_s22 = smov [#allocation3]  }
   0x8   : > { %p1103_p3 = pnand %p721_p1, %p144_p2  ;;  %s156_s23 = sshll.u32 %s1046_s22, 4  ;;  %s157_s23 = int_to_ptr.vmem [resolvable:$true] %s156_s23 }
   0x9   : > { %s1255_s21 = scalar_select %p1109_p4, 1, 0 }
   0xa   : > { %s1254_s20 = scalar_select %p1103_p3, 1, 0 }
   0xb   : > { %p831_p5 = pneg %p1103_p3  ;;  %s1047_s25 = smov [#allocation6]  }
   0xc   : > { %s169_s26 = sshll.u32 %s1047_s25, 4  ;;  %s928_s29 = scalar_lea.hbm %s1246_s0, 1024  ;;  %s1121_s26 = int_to_ptr.vmem [resolvable:$true] %s169_s26 }
   0xd   : > { %p1117_p6 = pnand %p1109_p4, %p831_p5  ;;  %p929_p7 = scmp.ne.s32.totalorder %s1246_s0, %s928_s29 }
   0xe   : > { %p935_p11 = scmp.lt.u32.totalorder %s928_s29, %s1246_s0 }
   0xf   : > { %p930_p8 = pneg %p1117_p6 }
  0x11   : > { %p931_p9 = pnand %p930_p8, %p929_p7 }
  0x13   : > { %p932_p10 = pneg %p931_p9 }
  0x15   : > { %p937_p12 = pnand %p935_p11, %p932_p10 }
  0x17   : > { %940 = shalt.err (!%p937_p12)
}
  0x18   : > { %s941_s8 = scalar_lea.vmem %s157_s23, 1024  ;;  %p949_p2 = scmp.lt.s32.totalorder %s157_s23, %s157_s23 }
  0x19   : > { %p942_p13 = scmp.ne.s32.totalorder %s157_s23, %s941_s8  ;;  %p950_p5 = scmp.lt.s32.totalorder %s941_s8, %s941_s8 }
  0x1b   : > { %p944_p0 = pnand %p942_p13, %p930_p8  ;;  %p951_p4 = por %p950_p5, %p949_p2 }
  0x1d   : > { %p945_p1 = pneg %p944_p0 }
  0x1f   : > { %p952_p3 = pnand %p951_p4, %p945_p1 }
  0x21   : > { %955 = shalt.err (!%p952_p3)
}
  0x22   : > { %s1048_s9 = smov 256   ;;  %s1049_s10 = smov 16  }
  0x23   : > { %834 = dma.hbm_to_vmem [thread:$0]  (!%p1117_p6), %s1246_s0, 1024, %s157_s23, [#allocation4], %s1048_s9, %s1048_s9, %s1049_s10  }
  0x24   : > { %s956_s22 = scalar_lea.hbm %s1247_s1, 4096 }
  0x25   : > { %p957_p7 = scmp.ne.s32.totalorder %s1247_s1, %s956_s22  ;;  %p963_p9 = scmp.lt.u32.totalorder %s956_s22, %s1247_s1 }
  0x27   : > { %p959_p3 = pnand %p957_p7, %p930_p8 }
  0x29   : > { %p960_p4 = pneg %p959_p3 }
  0x2b   : > { %p965_p10 = pnand %p963_p9, %p960_p4 }
  0x2d   : > { %968 = shalt.err (!%p965_p10)
}
  0x2e   : > { %s969_s23 = scalar_lea.vmem %s1121_s26, 4096  ;;  %p977_p0 = scmp.lt.s32.totalorder %s1121_s26, %s1121_s26 }
  0x2f   : > { %p970_p11 = scmp.ne.s32.totalorder %s1121_s26, %s969_s23  ;;  %p978_p1 = scmp.lt.s32.totalorder %s969_s23, %s969_s23 }
  0x31   : > { %p972_p12 = pnand %p970_p11, %p930_p8  ;;  %p979_p2 = por %p978_p1, %p977_p0 }
  0x33   : > { %p973_p13 = pneg %p972_p12 }
  0x35   : > { %p980_p5 = pnand %p979_p2, %p973_p13 }
  0x37   : > { %983 = shalt.err (!%p980_p5)
}
  0x38   : > { %s1050_s30 = smov 128   ;;  %s1051_s5 = smov 8  }
  0x39   : > { %837 = dma.hbm_to_vmem [thread:$0]  (!%p1117_p6), %s1247_s1, 4096, %s1121_s26, [#allocation7], %s1050_s30, %s1050_s30, %s1051_s5  }
  0x3a   : > { %p1257_p7 = scmp.ne.s32.totalorder %s1254_s20, 0 }
  0x3b   : > { %p1258_p8 = scmp.ne.s32.totalorder (!%p1257_p7), %s1255_s21, 0 }
  0x3c   : > { %191 = sbr.rel (%p1257_p7) target bundleno = 613 (0x265), region = 36 }
  0x43   : > { %1023 = dma.done.wait (%p1258_p8), [#allocation4], 1024  }
  0x44   : > { %1025 = vsyncadd (%p1258_p8), [#allocation4], 4294966272 }
  0x45   : > { %1027 = dma.done.wait (%p1258_p8), [#allocation7], 4096  }
  0x46   : > { %1029 = vsyncadd (%p1258_p8), [#allocation7], 4294963200  ;;  %p212_p3 = scmp.eq.s32.totalorder %s1036_s15, 0 }
  0x47   : > { %v218_v0 = vld [vmem:[#allocation3] sm:$0xff] (%p212_p3)  ;;  %v220_v1 = vld [vmem:[#allocation3 + $0x10] sm:$0xff] (%p212_p3)  ;;  %v219_v2 = vld [vmem:[#allocation3 + $0x8] sm:$0xff] (%p212_p3) }
  0x48   : > { %217 = sbr.rel (!%p212_p3) target bundleno = 79 (0x4f), region = 48  ;;  %v226_v3 = vpack.c.bf16 (%p212_p3), %v220_v1, %v218_v0  ;;  %v221_v4 = vld [vmem:[#allocation3 + $0x18] sm:$0xff] (%p212_p3)  ;;  %v222_v5 = vld [vmem:[#allocation3 + $0x20] sm:$0xff] (%p212_p3)  ;;  %v224_v6 = vld [vmem:[#allocation3 + $0x30] sm:$0xff] (%p212_p3) }
  0x49   : > { %v227_v7 = vpack.c.bf16 (%p212_p3), %v221_v4, %v219_v2  ;;  %v228_v8 = vpack.c.bf16 (%p212_p3), %v224_v6, %v222_v5  ;;  %v223_v9 = vld [vmem:[#allocation3 + $0x28] sm:$0xff] (%p212_p3)  ;;  %v225_v10 = vld [vmem:[#allocation3 + $0x38] sm:$0xff] (%p212_p3) }
  0x4a   : > { %230 = vst [vmem:[#allocation2] sm:$0xff] (%p212_p3), %v226_v3  ;;  %v229_v11 = vpack.c.bf16 (%p212_p3), %v225_v10, %v223_v9 }
  0x4b   : > { %231 = vst [vmem:[#allocation2 + $0x8] sm:$0xff] (%p212_p3), %v227_v7  ;;  %232 = vst [vmem:[#allocation2 + $0x20] sm:$0xff] (%p212_p3), %v228_v8 }
  0x4c   : > { %233 = vst [vmem:[#allocation2 + $0x28] sm:$0xff] (%p212_p3), %v229_v11 }
  0x4f PF: > { %v879_v12 = vld [vmem:[#allocation6 + $0x4] ss:$8 sps:$4 sm:$0xff]   ;;  %p234_p6 = scmp.lt.s32.totalorder %s1036_s15, 0  ;;  %s235_s20 = ssub.s32 0, %s1036_s15  ;;  %v881_v13 = vld [vmem:[#allocation6] ss:$8 sps:$4 sm:$0xff]  }
  0x50   : > { %s728_s21 = smin.u32 %s1036_s15, %s235_s20  ;;  %471 = vmatprep.subr.bf16.mxu0 %v879_v12  ;;  %783 = vmatprep.subr.bf16.mxu1 %v879_v12  ;;  %v882_v14 = vld [vmem:[#allocation6 + $0x14] ss:$8 sps:$4 sm:$0xff]   ;;  %v884_v15 = vld [vmem:[#allocation6 + $0x10] ss:$8 sps:$4 sm:$0xff]   ;;  %v885_v16 = vld [vmem:[#allocation6 + $0x24] ss:$8 sps:$4 sm:$0xff]  }
  0x51   : > { %s237_s24 = sand.u32 1, %s728_s21   ;;  %472 = vmatpush1.bf16.msra.mxu0 %v881_v13  ;;  %799 = vmatpush1.bf16.msra.mxu1 %v881_v13  ;;  %v887_v17 = vld [vmem:[#allocation6 + $0x20] ss:$8 sps:$4 sm:$0xff]   ;;  %v888_v18 = vld [vmem:[#allocation6 + $0x34] ss:$8 sps:$4 sm:$0xff]   ;;  %p767_p9 = scmp.ne.s32.totalorder %s1036_s15, 2 }
  0x52   : > { %s238_s26 = ssub.s32 0, %s237_s24  ;;  %473 = vmatprep.subr.bf16.mxu0 %v882_v14  ;;  %784 = vmatprep.subr.bf16.mxu1 %v882_v14  ;;  %v890_v19 = vld [vmem:[#allocation6 + $0x30] ss:$8 sps:$4 sm:$0xff]   ;;  %v891_v20 = vld [vmem:[#allocation6 + $0x44] ss:$8 sps:$4 sm:$0xff]   ;;  %vm554_vm0 = vcmask (!%p767_p9), 261120  }
  0x53   : > { %s1265_s26 = smov (!%p234_p6, %s238_s26), %s237_s24  ;;  %v893_v21 = vld [vmem:[#allocation6 + $0x40] ss:$8 sps:$4 sm:$0xff]   ;;  %v894_v22 = vld [vmem:[#allocation6 + $0x54] ss:$8 sps:$4 sm:$0xff]   ;;  %v896_v23 = vld [vmem:[#allocation6 + $0x50] ss:$8 sps:$4 sm:$0xff]  }
  0x54   : > { %p730_p4 = scmp.lt.s32.totalorder %s1265_s26, 0  ;;  %s244_s8 = sadd.s32 2, %s1265_s26  ;;  %v897_v24 = vld [vmem:[#allocation6 + $0x64] ss:$8 sps:$4 sm:$0xff]   ;;  %v899_v27 = vld [vmem:[#allocation6 + $0x60] ss:$8 sps:$4 sm:$0xff]  }
  0x55   : > { %474 = vmatpush1.bf16.msra.mxu0 %v884_v15  ;;  %800 = vmatpush1.bf16.msra.mxu1 %v884_v15  ;;  %v900_v28 = vld [vmem:[#allocation6 + $0x74] ss:$8 sps:$4 sm:$0xff]   ;;  %v902_v29 = vld [vmem:[#allocation6 + $0x70] ss:$8 sps:$4 sm:$0xff]   ;;  %v903_v30 = vld [vmem:[#allocation6 + $0x84] ss:$8 sps:$4 sm:$0xff]  }
  0x56   : > { %475 = vmatprep.subr.bf16.mxu0 %v885_v16  ;;  %785 = vmatprep.subr.bf16.mxu1 %v885_v16  ;;  %s1267_s8 = smov (!%p730_p4, %s244_s8), %s1265_s26  ;;  %v905_v31 = vld [vmem:[#allocation6 + $0x80] ss:$8 sps:$4 sm:$0xff]   ;;  %v906_v32 = vld [vmem:[#allocation6 + $0x94] ss:$8 sps:$4 sm:$0xff]   ;;  %v908_v33 = vld [vmem:[#allocation6 + $0x90] ss:$8 sps:$4 sm:$0xff]  }
  0x57   : > { %s731_s9 = sshll.u32 %s1267_s8, 8  ;;  %v909_v34 = vld [vmem:[#allocation6 + $0xa4] ss:$8 sps:$4 sm:$0xff]   ;;  %v911_v35 = vld [vmem:[#allocation6 + $0xa0] ss:$8 sps:$4 sm:$0xff]   ;;  %s248_s13 = ssub.s32 1, %s1267_s8 }
  0x58   : > { %s251_s10 = sshra.s32 %s731_s9, 7  ;;  %v912_v36 = vld [vmem:[#allocation6 + $0xb4] ss:$8 sps:$4 sm:$0xff]   ;;  %v914_v37 = vld [vmem:[#allocation6 + $0xb0] ss:$8 sps:$4 sm:$0xff]   ;;  %v299_v48 = vld [vmem:[#allocation3 + $0x20] sm:$0xff] }
  0x59   : > { %476 = vmatpush1.bf16.msra.mxu0 %v887_v17  ;;  %801 = vmatpush1.bf16.msra.mxu1 %v887_v17  ;;  %s733_s11 = sshll.u32 %s251_s10, 3  ;;  %v915_v38 = vld [vmem:[#allocation6 + $0xc4] ss:$8 sps:$4 sm:$0xff]   ;;  %v917_v39 = vld [vmem:[#allocation6 + $0xc0] ss:$8 sps:$4 sm:$0xff]   ;;  %s732_s14 = sshll.u32 %s248_s13, 8 }
  0x5a   : > { %477 = vmatprep.subr.bf16.mxu0 %v888_v18  ;;  %786 = vmatprep.subr.bf16.mxu1 %v888_v18  ;;  %s1189_s12 = scalar_lea.vmem [#allocation2], %s733_s11  ;;  %v918_v40 = vld [vmem:[#allocation6 + $0xd4] ss:$8 sps:$4 sm:$0xff]   ;;  %v920_v41 = vld [vmem:[#allocation6 + $0xd0] ss:$8 sps:$4 sm:$0xff]   ;;  %v295_v49 = vld [vmem:[#allocation3] sm:$0xff] }
  0x5b   : > { %v256_v25 = vld [vmem:[%s1189_s12 + $0x8] sm:$0xff]  ;;  %v924_v44 = vld [vmem:[#allocation6 + $0xf4] ss:$8 sps:$4 sm:$0xff]   ;;  %v926_v45 = vld [vmem:[#allocation6 + $0xf0] ss:$8 sps:$4 sm:$0xff]   ;;  %s528_s22 = sshra.s32 %s732_s14, 7 }
  0x5c   : > { %v258_v26 = vld [vmem:[%s1189_s12 + $0x28] sm:$0xff]  ;;  %503 = vmatprep.mubr.bf16.mxu0 %v256_v25  ;;  %v255_v46 = vld [vmem:[%s1189_s12] sm:$0xff]  ;;  %v297_v52 = vld [vmem:[#allocation3 + $0x10] sm:$0xff]  ;;  %v307_v54 = vmul.f32 0.2, %v299_v48  ;;  %s766_s25 = sshll.u32 %s528_s22, 3 }
  0x5d   : > { %478 = vmatpush1.bf16.msra.mxu0 %v890_v19  ;;  %802 = vmatpush1.bf16.msra.mxu1 %v890_v19  ;;  %v921_v42 = vld [vmem:[#allocation6 + $0xe4] ss:$8 sps:$4 sm:$0xff]   ;;  %v923_v43 = vld [vmem:[#allocation6 + $0xe0] ss:$8 sps:$4 sm:$0xff]   ;;  %v301_v53 = vld [vmem:[#allocation3 + $0x30] sm:$0xff]  ;;  %s531_s27 = scalar_lea.vmem [#allocation2], %s766_s25 }
  0x5e   : > { %479 = vmatprep.subr.bf16.mxu0 %v891_v20  ;;  %787 = vmatprep.subr.bf16.mxu1 %v891_v20  ;;  %v257_v47 = vld [vmem:[%s1189_s12 + $0x20] sm:$0xff]  ;;  %v296_v50 = vld [vmem:[#allocation3 + $0x8] sm:$0xff]  ;;  %v298_v55 = vld [vmem:[#allocation3 + $0x18] sm:$0xff]  ;;  %v303_v57 = vmul.f32 0.2, %v295_v49  ;;  %v1052_v20 = vmov (!%p767_p9), 0.0  }
  0x5f   : > { %513 = vmatprep.mubr.bf16.mxu1 %v258_v26  ;;  %v300_v51 = vld [vmem:[#allocation3 + $0x28] sm:$0xff]  ;;  %v302_v56 = vld [vmem:[#allocation3 + $0x38] sm:$0xff]  ;;  %v304_v58 = vmul.f32 0.2, %v296_v50  ;;  %v305_v60 = vmul.f32 0.2, %v297_v52 }
  0x60   : > { %v308_v59 = vmul.f32 0.2, %v300_v51  ;;  %v309_v61 = vmul.f32 0.2, %v301_v53  ;;  %v306_v0 = vmul.f32 0.2, %v298_v55 }
  0x61   : > { %480 = vmatpush1.bf16.msra.mxu0 %v893_v21  ;;  %803 = vmatpush1.bf16.msra.mxu1 %v893_v21  ;;  %v310_v1 = vmul.f32 0.2, %v302_v56  ;;  %v542_v21 = vld [vmem:[%s1249_s3] sm:$0xff] (!%p767_p9)  ;;  %v543_v25 = vld [vmem:[%s1249_s3 + $0x8] sm:$0xff] (!%p767_p9) }
  0x62   : > { %481 = vmatprep.subr.bf16.mxu0 %v894_v22  ;;  %788 = vmatprep.subr.bf16.mxu1 %v894_v22  ;;  %v1053_v22 = vmov (!%p767_p9), 0  }
  0x63   : > { %927 = vset.pattern.permute.xlu0 (!%p767_p9), %v1053_v22 }
  0x64   : > { %546 = vperm.xlu0 (!%p767_p9), %927, %v542_v21  }
  0x65   : > { %482 = vmatpush1.bf16.msra.mxu0 %v896_v23  ;;  %804 = vmatpush1.bf16.msra.mxu1 %v896_v23  ;;  %v540_v23 = vld [vmem:[%s1248_s2] sm:$0xff] (!%p767_p9) }
  0x66   : > { %483 = vmatprep.subr.bf16.mxu0 %v897_v24  ;;  %789 = vmatprep.subr.bf16.mxu1 %v897_v24  ;;  %v541_v24 = vld [vmem:[%s1248_s2 + $0x8] sm:$0xff] (!%p767_p9) }
  0x68   : > { %551 = vperm.xlu0 (!%p767_p9), %927, %v543_v25  }
  0x69   : > { %484 = vmatpush1.bf16.msra.mxu0 %v899_v27  ;;  %805 = vmatpush1.bf16.msra.mxu1 %v899_v27 }
  0x6a   : > { %485 = vmatprep.subr.bf16.mxu0 %v900_v28  ;;  %790 = vmatprep.subr.bf16.mxu1 %v900_v28 }
  0x6d   : > { %486 = vmatpush1.bf16.msra.mxu0 %v902_v29  ;;  %806 = vmatpush1.bf16.msra.mxu1 %v902_v29 }
  0x6e   : > { %487 = vmatprep.subr.bf16.mxu0 %v903_v30  ;;  %791 = vmatprep.subr.bf16.mxu1 %v903_v30 }
  0x71   : > { %488 = vmatpush1.bf16.msra.mxu0 %v905_v31  ;;  %807 = vmatpush1.bf16.msra.mxu1 %v905_v31 }
  0x72   : > { %489 = vmatprep.subr.bf16.mxu0 %v906_v32  ;;  %792 = vmatprep.subr.bf16.mxu1 %v906_v32 }
  0x75   : > { %490 = vmatpush1.bf16.msra.mxu0 %v908_v33  ;;  %808 = vmatpush1.bf16.msra.mxu1 %v908_v33 }
  0x76   : > { %491 = vmatprep.subr.bf16.mxu0 %v909_v34  ;;  %793 = vmatprep.subr.bf16.mxu1 %v909_v34 }
  0x79   : > { %492 = vmatpush1.bf16.msra.mxu0 %v911_v35  ;;  %809 = vmatpush1.bf16.msra.mxu1 %v911_v35 }
  0x7a   : > { %493 = vmatprep.subr.bf16.mxu0 %v912_v36  ;;  %794 = vmatprep.subr.bf16.mxu1 %v912_v36 }
  0x7d   : > { %494 = vmatpush1.bf16.msra.mxu0 %v914_v37  ;;  %810 = vmatpush1.bf16.msra.mxu1 %v914_v37 }
  0x7e   : > { %495 = vmatprep.subr.bf16.mxu0 %v915_v38  ;;  %795 = vmatprep.subr.bf16.mxu1 %v915_v38 }
  0x81   : > { %496 = vmatpush1.bf16.msra.mxu0 %v917_v39  ;;  %811 = vmatpush1.bf16.msra.mxu1 %v917_v39 }
  0x82   : > { %497 = vmatprep.subr.bf16.mxu0 %v918_v40  ;;  %796 = vmatprep.subr.bf16.mxu1 %v918_v40 }
  0x85   : > { %498 = vmatpush1.bf16.msra.mxu0 %v920_v41  ;;  %812 = vmatpush1.bf16.msra.mxu1 %v920_v41 }
  0x86   : > { %499 = vmatprep.subr.bf16.mxu0 %v921_v42  ;;  %797 = vmatprep.subr.bf16.mxu1 %v921_v42 }
  0x89   : > { %500 = vmatpush1.bf16.msra.mxu0 %v923_v43  ;;  %813 = vmatpush1.bf16.msra.mxu1 %v923_v43 }
  0x8a   : > { %501 = vmatprep.subr.bf16.mxu0 %v924_v44  ;;  %798 = vmatprep.subr.bf16.mxu1 %v924_v44 }
  0x8d   : > { %502 = vmatpush1.bf16.msra.mxu0 %v926_v45  ;;  %814 = vmatpush1.bf16.msra.mxu1 %v926_v45 }
  0x90   : > { %504 = vmatmul.mubr.bf16.vlgmr.msra.gmra.mrb[0].mxu0 %v255_v46  ;;  %514 = vmatmul.mubr.bf16.vlgmr.msra.gmra.mrb[0].mxu1 %v257_v47 }
  0x91   : > { %625 = vmatprep.mubr.f32.mxu0 (!%p767_p9), %v1052_v20  ;;  %631 = vmatprep.mubr.f32.mxu1 (!%p767_p9), %v1052_v20 }
  0xe3   : > { %v547_v26 = vpop.permute.xlu0 (!%p767_p9), %546 }
  0xe7   : > { %v552_v27 = vpop.permute.xlu0 (!%p767_p9), %551 }
 0x163   : > { %v505_v62 = vpop.f32.mrb[0].mxu0  ;;  %v515_v63 = vpop.f32.mrb[0].mxu1 }
 0x164   : > { %v516_v2 = vadd.f32 %v515_v63, %v307_v54  ;;  %v507_v3 = vpop.f32.mrb[1].mxu0  ;;  %v517_v4 = vpop.f32.mrb[1].mxu1  ;;  %v506_v7 = vadd.f32 %v505_v62, %v303_v57 }
 0x165   : > { %v509_v5 = vpop.f32.mrb[2].mxu0  ;;  %v519_v6 = vpop.f32.mrb[2].mxu1  ;;  %v508_v12 = vadd.f32 %v507_v3, %v304_v58  ;;  %v518_v13 = vadd.f32 %v517_v4, %v308_v59  ;;  %539 = sbr.rel (%p767_p9) target bundleno = 587 (0x24b), region = 52 }
 0x166   : > { %v510_v8 = vadd.f32 %v509_v5, %v305_v60  ;;  %v520_v9 = vadd.f32 %v519_v6, %v309_v61  ;;  %v511_v10 = vpop.f32.mrb[3].mxu0  ;;  %v521_v11 = vpop.f32.mrb[3].mxu1 }
 0x167   : > { %v512_v14 = vadd.f32 %v511_v10, %v306_v0  ;;  %v522_v15 = vadd.f32 %v521_v11, %v310_v1 }
 0x168   : > { %v524_v16 = vpack.c.bf16 %v510_v8, %v506_v7  ;;  %v526_v17 = vpack.c.bf16 %v520_v9, %v516_v2 }
 0x169   : > { %v525_v18 = vpack.c.bf16 %v512_v14, %v508_v12  ;;  %v527_v19 = vpack.c.bf16 %v522_v15, %v518_v13 }
 0x16a   : > { %532 = vst [vmem:[%s531_s27] sm:$0xff] %v524_v16  ;;  %534 = vst [vmem:[%s531_s27 + $0x20] sm:$0xff] %v526_v17 }
 0x16b   : > { %533 = vst [vmem:[%s531_s27 + $0x8] sm:$0xff] %v525_v18  ;;  %535 = vst [vmem:[%s531_s27 + $0x28] sm:$0xff] %v527_v19  ;;  %776 = vmatprep.subr.bf16.mxu0 (!%p767_p9), %v525_v18  ;;  %815 = vmatprep.subr.bf16.mxu1 (!%p767_p9), %v525_v18 }
 0x16c   : > { %778 = vmatpush1.bf16.msra.mxu0 %v524_v16  ;;  %817 = vmatpush1.bf16.msra.mxu1 %v524_v16 }
 0x16d   : > { %780 = vmatprep.subr.bf16.mxu0 %v527_v19  ;;  %816 = vmatprep.subr.bf16.mxu1 %v527_v19 }
 0x170   : > { %782 = vmatpush1.bf16.msra.mxu0 %v526_v17  ;;  %818 = vmatpush1.bf16.msra.mxu1 %v526_v17 }
 0x173   : > { %768 = vmatmul.mubr.msk.f32.vlgmr.msra.gmra.mrb[0].mxu0 %vm554_vm0, %v540_v23  ;;  %769 = vmatmul.mubr.msk.f32.vlgmr.msra.gmra.mrb[0].mxu1 %vm554_vm0, %v541_v24 }
 0x246   : > { %v627_v28 = vpop.f32.mrb[0].mxu0  ;;  %v633_v29 = vpop.f32.mrb[0].mxu1 }
 0x247   : > { %v628_v30 = vadd.f32 %v627_v28, %v547_v26  ;;  %v634_v31 = vadd.f32 %v633_v29, %v552_v27  ;;  %v629_v32 = vpop.f32.mrb[1].mxu0  ;;  %v635_v33 = vpop.f32.mrb[1].mxu1 }
 0x248   : > { %v630_v34 = vadd.f32 %v629_v32, %v547_v26  ;;  %v636_v35 = vadd.f32 %v635_v33, %v552_v27 }
 0x249   : > { %638 = vst [vmem:[#allocation8] sm:$0xff] %v628_v30  ;;  %640 = vst [vmem:[#allocation8 + $0x10] sm:$0xff] %v634_v31 }
 0x24a   : > { %639 = vst [vmem:[#allocation8 + $0x8] sm:$0xff] %v630_v34  ;;  %641 = vst [vmem:[#allocation8 + $0x18] sm:$0xff] %v636_v35 }
 0x24b PF: > { %p1211_p10 = scmp.eq.s32.totalorder %s720_s18, 2  ;;  %s1054_s21 = smov [#allocation8]  }
 0x24c   : > { %s651_s24 = sshll.u32 %s1054_s21, 4  ;;  %s652_s24 = int_to_ptr.vmem [resolvable:$true] %s651_s24 }
 0x24d   : > { %s984_s26 = scalar_lea.vmem %s652_s24, 512  ;;  %p991_p0 = scmp.lt.s32.totalorder %s652_s24, %s652_s24 }
 0x24e   : > { %p985_p11 = scmp.ne.s32.totalorder %s652_s24, %s984_s26  ;;  %p992_p1 = scmp.lt.s32.totalorder %s984_s26, %s984_s26 }
 0x250   : > { %p986_p12 = pnand %p985_p11, %p1211_p10  ;;  %p993_p2 = por %p992_p1, %p991_p0 }
 0x252   : > { %p987_p13 = pneg %p986_p12 }
 0x254   : > { %p994_p5 = pnand %p993_p2, %p987_p13 }
 0x256   : > { %997 = shalt.err (!%p994_p5)
}
 0x257   : > { %s998_s18 = scalar_lea.hbm %s1250_s4, 512 }
 0x258   : > { %p999_p7 = scmp.ne.s32.totalorder %s1250_s4, %s998_s18  ;;  %p1004_p6 = scmp.lt.u32.totalorder %s998_s18, %s1250_s4 }
 0x25a   : > { %p1000_p8 = pnand %p999_p7, %p1211_p10 }
 0x25c   : > { %p1001_p3 = pneg %p1000_p8 }
 0x25e   : > { %p1006_p4 = pnand %p1004_p6, %p1001_p3 }
 0x260   : > { %1009 = shalt.err (!%p1006_p4)
}
 0x261   : > { %s1055_s14 = smov 256   ;;  %s1056_s22 = smov 16  }
 0x262   : > { %828 = dma.vmem_to_hbm [thread:$0]  (%p1211_p10), %s652_s24, 512, %s1250_s4, [#allocation5], %s1055_s14, %s1055_s14, %s1056_s22  }
 0x263   : > { %1031 = dma.done.wait (%p1211_p10), [#allocation5], 512  }
 0x264   : > { %1033 = vsyncadd (%p1211_p10), [#allocation5], 4294966784 }
 0x265 PF: > { %s17_s17 = sadd.s32 1, %s1044_s17   ;;  %s1260_s15 = smov %s1040_s16 }
 0x266   : > { %p14_p9 = scmp.ge.s32.totalorder %s17_s17, 5   ;;  %s1261_s16 = smov %s1263_s19 }
 0x268   :  { %16 = sbr.rel (!%p14_p9) target bundleno = 4 (0x4), region = 81 }
 0x26f   :  { %667 = vsyncpa [#allocation4], 1 }
 0x270   :  { %669 = vsyncpa [#allocation4 + $0x1], 1 }
 0x271   :  { %670 = vsyncpa [#allocation7], 1 }
 0x272   :  { %671 = vsyncpa [#allocation5], 1 }
 0x273   :  { %673 = vsyncpa [#allocation5 + $0x1], 1 }

// kernel: tpu_custom_call.1
= control target key start
LH: loop header
LB: loop body
LE: loop exit
PB: predicated region body
PF: predicated region fallthrough
CT: control target
= control target key end

     0   :  { %9 = vsyncpa [#allocation4], 0  ;;  %s1246_s0 = inlined_call_operand.hbm [shape: f32[32,256], index: 0, kind: input, shape index: {}]   ;;  %s1247_s1 = inlined_call_operand.hbm [shape: bf16[256,256], index: 1, kind: input, shape index: {}]   ;;  %s1248_s2 = inlined_call_operand.vmem [shape: f32[16,32], index: 2, kind: input, shape index: {}]   ;;  %s1249_s3 = inlined_call_operand.vmem [shape: f32[16,1], index: 3, kind: input, shape index: {}]   ;;  %s1250_s4 = inlined_call_operand.hbm [shape: f32[16,256], index: 4, kind: output, shape index: {}]  }
   0x1   :  { %10 = vsyncpa [#allocation7], 0 }
   0x2   :  { %11 = vsyncpa [#allocation5], 0  ;;  %s1082_s15 = smov 0   ;;  %s1084_s16 = smov 0  }
   0x3   :  { %s1086_s17 = smov 0  }
   0x4 LB: > { %s720_s18 = sadd.s32 4294967295, %s1044_s17   ;;  %s29_s19 = sadd.s32 1, %s1040_s16  ;;  %s1044_s17 = sphi %s1086_s17, %s17_s17   ;;  %s1040_s16 = sphi %s1084_s16, %s1261_s16   ;;  %s1036_s15 = sphi %s1082_s15, %s1260_s15  }
   0x5   : > { %p31_p0 = scmp.ge.s32.totalorder %s29_s19, 3  ;;  %p721_p1 = scmp.ge.s32.totalorder %s1044_s17, 1 }
   0x6   : > { %p144_p2 = scmp.lt.s32.totalorder %s1044_s17, 4  ;;  %p1109_p4 = scmp.eq.s32.totalorder %s720_s18, 0 }
   0x7   : > { %s1263_s19 = smov (%p31_p0, %s29_s19), 0  ;;  %s1046_s22 = smov [#allocation3]  }
   0x8   : > { %p1103_p3 = pnand %p721_p1, %p144_p2  ;;  %s156_s23 = sshll.u32 %s1046_s22, 4  ;;  %s157_s23 = int_to_ptr.vmem [resolvable:$true] %s156_s23 }
   0x9   : > { %s1255_s21 = scalar_select %p1109_p4, 1, 0 }
   0xa   : > { %s1254_s20 = scalar_select %p1103_p3, 1, 0 }
   0xb   : > { %p831_p5 = pneg %p1103_p3  ;;  %s1047_s25 = smov [#allocation6]  }
   0xc   : > { %s169_s26 = sshll.u32 %s1047_s25, 4  ;;  %s928_s29 = scalar_lea.hbm %s1246_s0, 1024  ;;  %s1121_s26 = int_to_ptr.vmem [resolvable:$true] %s169_s26 }
   0xd   : > { %p1117_p6 = pnand %p1109_p4, %p831_p5  ;;  %p929_p7 = scmp.ne.s32.totalorder %s1246_s0, %s928_s29 }
   0xe   : > { %p935_p11 = scmp.lt.u32.totalorder %s928_s29, %s1246_s0 }
   0xf   : > { %p930_p8 = pneg %p1117_p6 }
  0x11   : > { %p931_p9 = pnand %p930_p8, %p929_p7 }
  0x13   : > { %p932_p10 = pneg %p931_p9 }
  0x15   : > { %p937_p12 = pnand %p935_p11, %p932_p10 }
  0x17   : > { %940 = shalt.err (!%p937_p12)
}
  0x18   : > { %s941_s8 = scalar_lea.vmem %s157_s23, 1024  ;;  %p949_p2 = scmp.lt.s32.totalorder %s157_s23, %s157_s23 }
  0x19   : > { %p942_p13 = scmp.ne.s32.totalorder %s157_s23, %s941_s8  ;;  %p950_p5 = scmp.lt.s32.totalorder %s941_s8, %s941_s8 }
  0x1b   : > { %p944_p0 = pnand %p942_p13, %p930_p8  ;;  %p951_p4 = por %p950_p5, %p949_p2 }
  0x1d   : > { %p945_p1 = pneg %p944_p0 }
  0x1f   : > { %p952_p3 = pnand %p951_p4, %p945_p1 }
  0x21   : > { %955 = shalt.err (!%p952_p3)
}
  0x22   : > { %s1048_s9 = smov 256   ;;  %s1049_s10 = smov 16  }
  0x23   : > { %834 = dma.hbm_to_vmem [thread:$0]  (!%p1117_p6), %s1246_s0, 1024, %s157_s23, [#allocation4], %s1048_s9, %s1048_s9, %s1049_s10  }
  0x24   : > { %s956_s22 = scalar_lea.hbm %s1247_s1, 4096 }
  0x25   : > { %p957_p7 = scmp.ne.s32.totalorder %s1247_s1, %s956_s22  ;;  %p963_p9 = scmp.lt.u32.totalorder %s956_s22, %s1247_s1 }
  0x27   : > { %p959_p3 = pnand %p957_p7, %p930_p8 }
  0x29   : > { %p960_p4 = pneg %p959_p3 }
  0x2b   : > { %p965_p10 = pnand %p963_p9, %p960_p4 }
  0x2d   : > { %968 = shalt.err (!%p965_p10)
}
  0x2e   : > { %s969_s23 = scalar_lea.vmem %s1121_s26, 4096  ;;  %p977_p0 = scmp.lt.s32.totalorder %s1121_s26, %s1121_s26 }
  0x2f   : > { %p970_p11 = scmp.ne.s32.totalorder %s1121_s26, %s969_s23  ;;  %p978_p1 = scmp.lt.s32.totalorder %s969_s23, %s969_s23 }
  0x31   : > { %p972_p12 = pnand %p970_p11, %p930_p8  ;;  %p979_p2 = por %p978_p1, %p977_p0 }
  0x33   : > { %p973_p13 = pneg %p972_p12 }
  0x35   : > { %p980_p5 = pnand %p979_p2, %p973_p13 }
  0x37   : > { %983 = shalt.err (!%p980_p5)
}
  0x38   : > { %s1050_s30 = smov 128   ;;  %s1051_s5 = smov 8  }
  0x39   : > { %837 = dma.hbm_to_vmem [thread:$0]  (!%p1117_p6), %s1247_s1, 4096, %s1121_s26, [#allocation7], %s1050_s30, %s1050_s30, %s1051_s5  }
  0x3a   : > { %p1257_p7 = scmp.ne.s32.totalorder %s1254_s20, 0 }
  0x3b   : > { %p1258_p8 = scmp.ne.s32.totalorder (!%p1257_p7), %s1255_s21, 0 }
  0x3c   : > { %191 = sbr.rel (%p1257_p7) target bundleno = 613 (0x265), region = 36 }
  0x43   : > { %1023 = dma.done.wait (%p1258_p8), [#allocation4], 1024  }
  0x44   : > { %1025 = vsyncadd (%p1258_p8), [#allocation4], 4294966272 }
  0x45   : > { %1027 = dma.done.wait (%p1258_p8), [#allocation7], 4096  }
  0x46   : > { %1029 = vsyncadd (%p1258_p8), [#allocation7], 4294963200  ;;  %p212_p3 = scmp.eq.s32.totalorder %s1036_s15, 0 }
  0x47   : > { %v218_v0 = vld [vmem:[#allocation3] sm:$0xff] (%p212_p3)  ;;  %v220_v1 = vld [vmem:[#allocation3 + $0x10] sm:$0xff] (%p212_p3)  ;;  %v219_v2 = vld [vmem:[#allocation3 + $0x8] sm:$0xff] (%p212_p3) }
  0x48   : > { %217 = sbr.rel (!%p212_p3) target bundleno = 79 (0x4f), region = 48  ;;  %v226_v3 = vpack.c.bf16 (%p212_p3), %v220_v1, %v218_v0  ;;  %v221_v4 = vld [vmem:[#allocation3 + $0x18] sm:$0xff] (%p212_p3)  ;;  %v222_v5 = vld [vmem:[#allocation3 + $0x20] sm:$0xff] (%p212_p3)  ;;  %v224_v6 = vld [vmem:[#allocation3 + $0x30] sm:$0xff] (%p212_p3) }
  0x49   : > { %v227_v7 = vpack.c.bf16 (%p212_p3), %v221_v4, %v219_v2  ;;  %v228_v8 = vpack.c.bf16 (%p212_p3), %v224_v6, %v222_v5  ;;  %v223_v9 = vld [vmem:[#allocation3 + $0x28] sm:$0xff] (%p212_p3)  ;;  %v225_v10 = vld [vmem:[#allocation3 + $0x38] sm:$0xff] (%p212_p3) }
  0x4a   : > { %230 = vst [vmem:[#allocation2] sm:$0xff] (%p212_p3), %v226_v3  ;;  %v229_v11 = vpack.c.bf16 (%p212_p3), %v225_v10, %v223_v9 }
  0x4b   : > { %231 = vst [vmem:[#allocation2 + $0x8] sm:$0xff] (%p212_p3), %v227_v7  ;;  %232 = vst [vmem:[#allocation2 + $0x20] sm:$0xff] (%p212_p3), %v228_v8 }
  0x4c   : > { %233 = vst [vmem:[#allocation2 + $0x28] sm:$0xff] (%p212_p3), %v229_v11 }
  0x4f PF: > { %v879_v12 = vld [vmem:[#allocation6 + $0x4] ss:$8 sps:$4 sm:$0xff]   ;;  %p234_p6 = scmp.lt.s32.totalorder %s1036_s15, 0  ;;  %s235_s20 = ssub.s32 0, %s1036_s15  ;;  %v881_v13 = vld [vmem:[#allocation6] ss:$8 sps:$4 sm:$0xff]  }
  0x50   : > { %s728_s21 = smin.u32 %s1036_s15, %s235_s20  ;;  %471 = vmatprep.subr.bf16.mxu0 %v879_v12  ;;  %783 = vmatprep.subr.bf16.mxu1 %v879_v12  ;;  %v882_v14 = vld [vmem:[#allocation6 + $0x14] ss:$8 sps:$4 sm:$0xff]   ;;  %v884_v15 = vld [vmem:[#allocation6 + $0x10] ss:$8 sps:$4 sm:$0xff]   ;;  %v885_v16 = vld [vmem:[#allocation6 + $0x24] ss:$8 sps:$4 sm:$0xff]  }
  0x51   : > { %s237_s24 = sand.u32 1, %s728_s21   ;;  %472 = vmatpush1.bf16.msra.mxu0 %v881_v13  ;;  %799 = vmatpush1.bf16.msra.mxu1 %v881_v13  ;;  %v887_v17 = vld [vmem:[#allocation6 + $0x20] ss:$8 sps:$4 sm:$0xff]   ;;  %v888_v18 = vld [vmem:[#allocation6 + $0x34] ss:$8 sps:$4 sm:$0xff]   ;;  %p767_p9 = scmp.ne.s32.totalorder %s1036_s15, 2 }
  0x52   : > { %s238_s26 = ssub.s32 0, %s237_s24  ;;  %473 = vmatprep.subr.bf16.mxu0 %v882_v14  ;;  %784 = vmatprep.subr.bf16.mxu1 %v882_v14  ;;  %v890_v19 = vld [vmem:[#allocation6 + $0x30] ss:$8 sps:$4 sm:$0xff]   ;;  %v891_v20 = vld [vmem:[#allocation6 + $0x44] ss:$8 sps:$4 sm:$0xff]   ;;  %vm554_vm0 = vcmask (!%p767_p9), 261120  }
  0x53   : > { %s1265_s26 = smov (!%p234_p6, %s238_s26), %s237_s24  ;;  %v893_v21 = vld [vmem:[#allocation6 + $0x40] ss:$8 sps:$4 sm:$0xff]   ;;  %v894_v22 = vld [vmem:[#allocation6 + $0x54] ss:$8 sps:$4 sm:$0xff]   ;;  %v896_v23 = vld [vmem:[#allocation6 + $0x50] ss:$8 sps:$4 sm:$0xff]  }
  0x54   : > { %p730_p4 = scmp.lt.s32.totalorder %s1265_s26, 0  ;;  %s244_s8 = sadd.s32 2, %s1265_s26  ;;  %v897_v24 = vld [vmem:[#allocation6 + $0x64] ss:$8 sps:$4 sm:$0xff]   ;;  %v899_v27 = vld [vmem:[#allocation6 + $0x60] ss:$8 sps:$4 sm:$0xff]  }
  0x55   : > { %474 = vmatpush1.bf16.msra.mxu0 %v884_v15  ;;  %800 = vmatpush1.bf16.msra.mxu1 %v884_v15  ;;  %v900_v28 = vld [vmem:[#allocation6 + $0x74] ss:$8 sps:$4 sm:$0xff]   ;;  %v902_v29 = vld [vmem:[#allocation6 + $0x70] ss:$8 sps:$4 sm:$0xff]   ;;  %v903_v30 = vld [vmem:[#allocation6 + $0x84] ss:$8 sps:$4 sm:$0xff]  }
  0x56   : > { %475 = vmatprep.subr.bf16.mxu0 %v885_v16  ;;  %785 = vmatprep.subr.bf16.mxu1 %v885_v16  ;;  %s1267_s8 = smov (!%p730_p4, %s244_s8), %s1265_s26  ;;  %v905_v31 = vld [vmem:[#allocation6 + $0x80] ss:$8 sps:$4 sm:$0xff]   ;;  %v906_v32 = vld [vmem:[#allocation6 + $0x94] ss:$8 sps:$4 sm:$0xff]   ;;  %v908_v33 = vld [vmem:[#allocation6 + $0x90] ss:$8 sps:$4 sm:$0xff]  }
  0x57   : > { %s731_s9 = sshll.u32 %s1267_s8, 8  ;;  %v909_v34 = vld [vmem:[#allocation6 + $0xa4] ss:$8 sps:$4 sm:$0xff]   ;;  %v911_v35 = vld [vmem:[#allocation6 + $0xa0] ss:$8 sps:$4 sm:$0xff]   ;;  %s248_s13 = ssub.s32 1, %s1267_s8 }
  0x58   : > { %s251_s10 = sshra.s32 %s731_s9, 7  ;;  %v912_v36 = vld [vmem:[#allocation6 + $0xb4] ss:$8 sps:$4 sm:$0xff]   ;;  %v914_v37 = vld [vmem:[#allocation6 + $0xb0] ss:$8 sps:$4 sm:$0xff]   ;;  %v299_v48 = vld [vmem:[#allocation3 + $0x20] sm:$0xff] }
  0x59   : > { %476 = vmatpush1.bf16.msra.mxu0 %v887_v17  ;;  %801 = vmatpush1.bf16.msra.mxu1 %v887_v17  ;;  %s733_s11 = sshll.u32 %s251_s10, 3  ;;  %v915_v38 = vld [vmem:[#allocation6 + $0xc4] ss:$8 sps:$4 sm:$0xff]   ;;  %v917_v39 = vld [vmem:[#allocation6 + $0xc0] ss:$8 sps:$4 sm:$0xff]   ;;  %s732_s14 = sshll.u32 %s248_s13, 8 }
  0x5a   : > { %477 = vmatprep.subr.bf16.mxu0 %v888_v18  ;;  %786 = vmatprep.subr.bf16.mxu1 %v888_v18  ;;  %s1189_s12 = scalar_lea.vmem [#allocation2], %s733_s11  ;;  %v918_v40 = vld [vmem:[#allocation6 + $0xd4] ss:$8 sps:$4 sm:$0xff]   ;;  %v920_v41 = vld [vmem:[#allocation6 + $0xd0] ss:$8 sps:$4 sm:$0xff]   ;;  %v295_v49 = vld [vmem:[#allocation3] sm:$0xff] }
  0x5b   : > { %v256_v25 = vld [vmem:[%s1189_s12 + $0x8] sm:$0xff]  ;;  %v924_v44 = vld [vmem:[#allocation6 + $0xf4] ss:$8 sps:$4 sm:$0xff]   ;;  %v926_v45 = vld [vmem:[#allocation6 + $0xf0] ss:$8 sps:$4 sm:$0xff]   ;;  %s528_s22 = sshra.s32 %s732_s14, 7 }
  0x5c   : > { %v258_v26 = vld [vmem:[%s1189_s12 + $0x28] sm:$0xff]  ;;  %503 = vmatprep.mubr.bf16.mxu0 %v256_v25  ;;  %v255_v46 = vld [vmem:[%s1189_s12] sm:$0xff]  ;;  %v297_v52 = vld [vmem:[#allocation3 + $0x10] sm:$0xff]  ;;  %v307_v54 = vmul.f32 0.2, %v299_v48  ;;  %s766_s25 = sshll.u32 %s528_s22, 3 }
  0x5d   : > { %478 = vmatpush1.bf16.msra.mxu0 %v890_v19  ;;  %802 = vmatpush1.bf16.msra.mxu1 %v890_v19  ;;  %v921_v42 = vld [vmem:[#allocation6 + $0xe4] ss:$8 sps:$4 sm:$0xff]   ;;  %v923_v43 = vld [vmem:[#allocation6 + $0xe0] ss:$8 sps:$4 sm:$0xff]   ;;  %v301_v53 = vld [vmem:[#allocation3 + $0x30] sm:$0xff]  ;;  %s531_s27 = scalar_lea.vmem [#allocation2], %s766_s25 }
  0x5e   : > { %479 = vmatprep.subr.bf16.mxu0 %v891_v20  ;;  %787 = vmatprep.subr.bf16.mxu1 %v891_v20  ;;  %v257_v47 = vld [vmem:[%s1189_s12 + $0x20] sm:$0xff]  ;;  %v296_v50 = vld [vmem:[#allocation3 + $0x8] sm:$0xff]  ;;  %v298_v55 = vld [vmem:[#allocation3 + $0x18] sm:$0xff]  ;;  %v303_v57 = vmul.f32 0.2, %v295_v49  ;;  %v1052_v20 = vmov (!%p767_p9), 0.0  }
  0x5f   : > { %513 = vmatprep.mubr.bf16.mxu1 %v258_v26  ;;  %v300_v51 = vld [vmem:[#allocation3 + $0x28] sm:$0xff]  ;;  %v302_v56 = vld [vmem:[#allocation3 + $0x38] sm:$0xff]  ;;  %v304_v58 = vmul.f32 0.2, %v296_v50  ;;  %v305_v60 = vmul.f32 0.2, %v297_v52 }
  0x60   : > { %v308_v59 = vmul.f32 0.2, %v300_v51  ;;  %v309_v61 = vmul.f32 0.2, %v301_v53  ;;  %v306_v0 = vmul.f32 0.2, %v298_v55 }
  0x61   : > { %480 = vmatpush1.bf16.msra.mxu0 %v893_v21  ;;  %803 = vmatpush1.bf16.msra.mxu1 %v893_v21  ;;  %v310_v1 = vmul.f32 0.2, %v302_v56  ;;  %v542_v21 = vld [vmem:[%s1249_s3] sm:$0xff] (!%p767_p9)  ;;  %v543_v25 = vld [vmem:[%s1249_s3 + $0x8] sm:$0xff] (!%p767_p9) }
  0x62   : > { %481 = vmatprep.subr.bf16.mxu0 %v894_v22  ;;  %788 = vmatprep.subr.bf16.mxu1 %v894_v22  ;;  %v1053_v22 = vmov (!%p767_p9), 0  }
  0x63   : > { %927 = vset.pattern.permute.xlu0 (!%p767_p9), %v1053_v22 }
  0x64   : > { %546 = vperm.xlu0 (!%p767_p9), %927, %v542_v21  }
  0x65   : > { %482 = vmatpush1.bf16.msra.mxu0 %v896_v23  ;;  %804 = vmatpush1.bf16.msra.mxu1 %v896_v23  ;;  %v540_v23 = vld [vmem:[%s1248_s2] sm:$0xff] (!%p767_p9) }
  0x66   : > { %483 = vmatprep.subr.bf16.mxu0 %v897_v24  ;;  %789 = vmatprep.subr.bf16.mxu1 %v897_v24  ;;  %v541_v24 = vld [vmem:[%s1248_s2 + $0x8] sm:$0xff] (!%p767_p9) }
  0x68   : > { %551 = vperm.xlu0 (!%p767_p9), %927, %v543_v25  }
  0x69   : > { %484 = vmatpush1.bf16.msra.mxu0 %v899_v27  ;;  %805 = vmatpush1.bf16.msra.mxu1 %v899_v27 }
  0x6a   : > { %485 = vmatprep.subr.bf16.mxu0 %v900_v28  ;;  %790 = vmatprep.subr.bf16.mxu1 %v900_v28 }
  0x6d   : > { %486 = vmatpush1.bf16.msra.mxu0 %v902_v29  ;;  %806 = vmatpush1.bf16.msra.mxu1 %v902_v29 }
  0x6e   : > { %487 = vmatprep.subr.bf16.mxu0 %v903_v30  ;;  %791 = vmatprep.subr.bf16.mxu1 %v903_v30 }
  0x71   : > { %488 = vmatpush1.bf16.msra.mxu0 %v905_v31  ;;  %807 = vmatpush1.bf16.msra.mxu1 %v905_v31 }
  0x72   : > { %489 = vmatprep.subr.bf16.mxu0 %v906_v32  ;;  %792 = vmatprep.subr.bf16.mxu1 %v906_v32 }
  0x75   : > { %490 = vmatpush1.bf16.msra.mxu0 %v908_v33  ;;  %808 = vmatpush1.bf16.msra.mxu1 %v908_v33 }
  0x76   : > { %491 = vmatprep.subr.bf16.mxu0 %v909_v34  ;;  %793 = vmatprep.subr.bf16.mxu1 %v909_v34 }
  0x79   : > { %492 = vmatpush1.bf16.msra.mxu0 %v911_v35  ;;  %809 = vmatpush1.bf16.msra.mxu1 %v911_v35 }
  0x7a   : > { %493 = vmatprep.subr.bf16.mxu0 %v912_v36  ;;  %794 = vmatprep.subr.bf16.mxu1 %v912_v36 }
  0x7d   : > { %494 = vmatpush1.bf16.msra.mxu0 %v914_v37  ;;  %810 = vmatpush1.bf16.msra.mxu1 %v914_v37 }
  0x7e   : > { %495 = vmatprep.subr.bf16.mxu0 %v915_v38  ;;  %795 = vmatprep.subr.bf16.mxu1 %v915_v38 }
  0x81   : > { %496 = vmatpush1.bf16.msra.mxu0 %v917_v39  ;;  %811 = vmatpush1.bf16.msra.mxu1 %v917_v39 }
  0x82   : > { %497 = vmatprep.subr.bf16.mxu0 %v918_v40  ;;  %796 = vmatprep.subr.bf16.mxu1 %v918_v40 }
  0x85   : > { %498 = vmatpush1.bf16.msra.mxu0 %v920_v41  ;;  %812 = vmatpush1.bf16.msra.mxu1 %v920_v41 }
  0x86   : > { %499 = vmatprep.subr.bf16.mxu0 %v921_v42  ;;  %797 = vmatprep.subr.bf16.mxu1 %v921_v42 }
  0x89   : > { %500 = vmatpush1.bf16.msra.mxu0 %v923_v43  ;;  %813 = vmatpush1.bf16.msra.mxu1 %v923_v43 }
  0x8a   : > { %501 = vmatprep.subr.bf16.mxu0 %v924_v44  ;;  %798 = vmatprep.subr.bf16.mxu1 %v924_v44 }
  0x8d   : > { %502 = vmatpush1.bf16.msra.mxu0 %v926_v45  ;;  %814 = vmatpush1.bf16.msra.mxu1 %v926_v45 }
  0x90   : > { %504 = vmatmul.mubr.bf16.vlgmr.msra.gmra.mrb[0].mxu0 %v255_v46  ;;  %514 = vmatmul.mubr.bf16.vlgmr.msra.gmra.mrb[0].mxu1 %v257_v47 }
  0x91   : > { %625 = vmatprep.mubr.f32.mxu0 (!%p767_p9), %v1052_v20  ;;  %631 = vmatprep.mubr.f32.mxu1 (!%p767_p9), %v1052_v20 }
  0xe3   : > { %v547_v26 = vpop.permute.xlu0 (!%p767_p9), %546 }
  0xe7   : > { %v552_v27 = vpop.permute.xlu0 (!%p767_p9), %551 }
 0x163   : > { %v505_v62 = vpop.f32.mrb[0].mxu0  ;;  %v515_v63 = vpop.f32.mrb[0].mxu1 }
 0x164   : > { %v516_v2 = vadd.f32 %v515_v63, %v307_v54  ;;  %v507_v3 = vpop.f32.mrb[1].mxu0  ;;  %v517_v4 = vpop.f32.mrb[1].mxu1  ;;  %v506_v7 = vadd.f32 %v505_v62, %v303_v57 }
 0x165   : > { %v509_v5 = vpop.f32.mrb[2].mxu0  ;;  %v519_v6 = vpop.f32.mrb[2].mxu1  ;;  %v508_v12 = vadd.f32 %v507_v3, %v304_v58  ;;  %v518_v13 = vadd.f32 %v517_v4, %v308_v59  ;;  %539 = sbr.rel (%p767_p9) target bundleno = 587 (0x24b), region = 52 }
 0x166   : > { %v510_v8 = vadd.f32 %v509_v5, %v305_v60  ;;  %v520_v9 = vadd.f32 %v519_v6, %v309_v61  ;;  %v511_v10 = vpop.f32.mrb[3].mxu0  ;;  %v521_v11 = vpop.f32.mrb[3].mxu1 }
 0x167   : > { %v512_v14 = vadd.f32 %v511_v10, %v306_v0  ;;  %v522_v15 = vadd.f32 %v521_v11, %v310_v1 }
 0x168   : > { %v524_v16 = vpack.c.bf16 %v510_v8, %v506_v7  ;;  %v526_v17 = vpack.c.bf16 %v520_v9, %v516_v2 }
 0x169   : > { %v525_v18 = vpack.c.bf16 %v512_v14, %v508_v12  ;;  %v527_v19 = vpack.c.bf16 %v522_v15, %v518_v13 }
 0x16a   : > { %532 = vst [vmem:[%s531_s27] sm:$0xff] %v524_v16  ;;  %534 = vst [vmem:[%s531_s27 + $0x20] sm:$0xff] %v526_v17 }
 0x16b   : > { %533 = vst [vmem:[%s531_s27 + $0x8] sm:$0xff] %v525_v18  ;;  %535 = vst [vmem:[%s531_s27 + $0x28] sm:$0xff] %v527_v19  ;;  %776 = vmatprep.subr.bf16.mxu0 (!%p767_p9), %v525_v18  ;;  %815 = vmatprep.subr.bf16.mxu1 (!%p767_p9), %v525_v18 }
 0x16c   : > { %778 = vmatpush1.bf16.msra.mxu0 %v524_v16  ;;  %817 = vmatpush1.bf16.msra.mxu1 %v524_v16 }
 0x16d   : > { %780 = vmatprep.subr.bf16.mxu0 %v527_v19  ;;  %816 = vmatprep.subr.bf16.mxu1 %v527_v19 }
 0x170   : > { %782 = vmatpush1.bf16.msra.mxu0 %v526_v17  ;;  %818 = vmatpush1.bf16.msra.mxu1 %v526_v17 }
 0x173   : > { %768 = vmatmul.mubr.msk.f32.vlgmr.msra.gmra.mrb[0].mxu0 %vm554_vm0, %v540_v23  ;;  %769 = vmatmul.mubr.msk.f32.vlgmr.msra.gmra.mrb[0].mxu1 %vm554_vm0, %v541_v24 }
 0x246   : > { %v627_v28 = vpop.f32.mrb[0].mxu0  ;;  %v633_v29 = vpop.f32.mrb[0].mxu1 }
 0x247   : > { %v628_v30 = vadd.f32 %v627_v28, %v547_v26  ;;  %v634_v31 = vadd.f32 %v633_v29, %v552_v27  ;;  %v629_v32 = vpop.f32.mrb[1].mxu0  ;;  %v635_v33 = vpop.f32.mrb[1].mxu1 }
 0x248   : > { %v630_v34 = vadd.f32 %v629_v32, %v547_v26  ;;  %v636_v35 = vadd.f32 %v635_v33, %v552_v27 }
 0x249   : > { %638 = vst [vmem:[#allocation8] sm:$0xff] %v628_v30  ;;  %640 = vst [vmem:[#allocation8 + $0x10] sm:$0xff] %v634_v31 }
 0x24a   : > { %639 = vst [vmem:[#allocation8 + $0x8] sm:$0xff] %v630_v34  ;;  %641 = vst [vmem:[#allocation8 + $0x18] sm:$0xff] %v636_v35 }
 0x24b PF: > { %p1211_p10 = scmp.eq.s32.totalorder %s720_s18, 2  ;;  %s1054_s21 = smov [#allocation8]  }
 0x24c   : > { %s651_s24 = sshll.u32 %s1054_s21, 4  ;;  %s652_s24 = int_to_ptr.vmem [resolvable:$true] %s651_s24 }
 0x24d   : > { %s984_s26 = scalar_lea.vmem %s652_s24, 512  ;;  %p991_p0 = scmp.lt.s32.totalorder %s652_s24, %s652_s24 }
 0x24e   : > { %p985_p11 = scmp.ne.s32.totalorder %s652_s24, %s984_s26  ;;  %p992_p1 = scmp.lt.s32.totalorder %s984_s26, %s984_s26 }
 0x250   : > { %p986_p12 = pnand %p985_p11, %p1211_p10  ;;  %p993_p2 = por %p992_p1, %p991_p0 }
 0x252   : > { %p987_p13 = pneg %p986_p12 }
 0x254   : > { %p994_p5 = pnand %p993_p2, %p987_p13 }
 0x256   : > { %997 = shalt.err (!%p994_p5)
}
 0x257   : > { %s998_s18 = scalar_lea.hbm %s1250_s4, 512 }
 0x258   : > { %p999_p7 = scmp.ne.s32.totalorder %s1250_s4, %s998_s18  ;;  %p1004_p6 = scmp.lt.u32.totalorder %s998_s18, %s1250_s4 }
 0x25a   : > { %p1000_p8 = pnand %p999_p7, %p1211_p10 }
 0x25c   : > { %p1001_p3 = pneg %p1000_p8 }
 0x25e   : > { %p1006_p4 = pnand %p1004_p6, %p1001_p3 }
 0x260   : > { %1009 = shalt.err (!%p1006_p4)
}
 0x261   : > { %s1055_s14 = smov 256   ;;  %s1056_s22 = smov 16  }
 0x262   : > { %828 = dma.vmem_to_hbm [thread:$0]  (%p1211_p10), %s652_s24, 512, %s1250_s4, [#allocation5], %s1055_s14, %s1055_s14, %s1056_s22  }
 0x263   : > { %1031 = dma.done.wait (%p1211_p10), [#allocation5], 512  }
 0x264   : > { %1033 = vsyncadd (%p1211_p10), [#allocation5], 4294966784 }
 0x265 PF: > { %s17_s17 = sadd.s32 1, %s1044_s17   ;;  %s1260_s15 = smov %s1040_s16 }
 0x266   : > { %p14_p9 = scmp.ge.s32.totalorder %s17_s17, 5   ;;  %s1261_s16 = smov %s1263_s19 }
 0x268   :  { %16 = sbr.rel (!%p14_p9) target bundleno = 4 (0x4), region = 81 }
 0x26f   :  { %667 = vsyncpa [#allocation4], 1 }
 0x270   :  { %669 = vsyncpa [#allocation4 + $0x1], 1 }
 0x271   :  { %670 = vsyncpa [#allocation7], 1 }
 0x272   :  { %671 = vsyncpa [#allocation5], 1 }
 0x273   :  { %673 = vsyncpa [#allocation5 + $0x1], 1 }

</bundles_post_ra>
